<compile_context>
chip_gen: v6e
topology: v6e:2x2x1
jax: 0.10.0
libtpu: 0.0.40
codegen_flags: <defaults>
</compile_context>

<pallas_src>
import functools
import math

import jax
import jax.numpy as jnp
from jax.experimental import pallas as pl
from jax.experimental.pallas import tpu as pltpu


def _round_up(x, m):
    return (x + m - 1) // m * m


def _sinusoidal_kernel(t_ref, w_ref, phase_ref, out_ref, *, groups):
    """One batch tile.

    t_ref:     [TB, G]  f32 -- G timesteps packed per output row.
    w_ref:     [G,  L]  f32 -- row g holds freqs (tiled twice per dim) in lanes
                               [g*dim, (g+1)*dim), zeros elsewhere.  [1, L] when G == 1.
    phase_ref: [1,  L]  f32 -- 0 where the lane is a sin lane, pi/2 where cos.
    out_ref:   [TB, L]      -- row r, lanes [g*dim:(g+1)*dim) hold the embedding
                               of t_ref[r, g]  (first half sin, second half cos).
    """
    t = t_ref[...]                                       # [TB, G]
    phase = phase_ref[...]                               # [1, L]
    if groups > 1:
        # MXU: expansion across the lane groups + frequency scaling in one op.
        # Keep full f32 precision -- t (up to ~1000) must not round to bf16.
        ang = jnp.dot(t, w_ref[...],
                      preferred_element_type=jnp.float32,
                      precision=jax.lax.Precision.HIGHEST) + phase
    else:
        # Single timestep per row: lane-broadcast multiply, no MXU needed.
        ang = t * w_ref[...] + phase                     # [TB,1]*[1,L] -> [TB,L]
    out_ref[...] = jnp.sin(ang).astype(out_ref.dtype)    # one transcendental / elem


def sinusoidal_position_embeddings(time, dim, *, out_dtype=jnp.float32,
                                   vmem_out_budget_bytes=8 * 1024 * 1024):
    """Pallas equivalent of SinusoidalPositionEmbeddings(dim)(time) -> [B, dim]."""
    assert dim % 2 == 0 and dim >= 4, "dim must be even and >= 4"
    half_dim = dim // 2
    B = time.shape[0]

    # Frequencies / phases: identical f32 formula to the PyTorch module, built
    # once in the wrapper (constant-folded under jit), never inside the kernel.
    scale = math.log(10000.0) / (half_dim - 1)
    freqs = jnp.exp(jnp.arange(half_dim, dtype=jnp.float32) * -scale)   # [half]
    freqs_row = jnp.concatenate([freqs, freqs])                         # [dim]
    phase_row = jnp.concatenate(
        [jnp.zeros((half_dim,), jnp.float32),
         jnp.full((half_dim,), jnp.float32(math.pi / 2.0))])            # [dim]

    # Lane-dense packing: for dim < 128 (and dividing 128) pack G timesteps per
    # output row; otherwise pad the lane axis up to a multiple of 128 with zero
    # freqs so every store is an unmasked full-lane vst.
    if dim < 128 and 128 % dim == 0:
        groups = 128 // dim
    else:
        groups = 1
    l_logical = groups * dim
    L = _round_up(l_logical, 128)
    lane_pad = L - l_logical

    if groups > 1:
        # W[g, g*dim:(g+1)*dim] = freqs_row ; zeros elsewhere.
        w = jnp.kron(jnp.eye(groups, dtype=jnp.float32),
                     freqs_row.reshape(1, dim))                         # [G, L]
        phase_full = jnp.tile(phase_row, groups).reshape(1, L)
    else:
        w = jnp.pad(freqs_row, (0, lane_pad)).reshape(1, L)             # [1, L]
        phase_full = jnp.pad(phase_row, (0, lane_pad)).reshape(1, L)

    # Batch tiling: byte-budget the double-buffered f32/bf16 output tile
    # (<= ~8 MiB total -> fits v5e's 16 MiB default scoped VMEM with room for
    # the tiny inputs), and keep >= 2 grid steps when possible so the
    # "parallel" grid axis shards across v7x's two TensorCores.
    rows_needed = -(-B // groups)
    out_row_bytes = L * jnp.dtype(out_dtype).itemsize
    tb_budget = max(8, (vmem_out_budget_bytes // (2 * out_row_bytes)) // 8 * 8)
    tb_split = _round_up(-(-rows_needed // 2), 8)
    TB = max(8, min(tb_budget, tb_split))
    Rp = _round_up(rows_needed, TB)

    t_flat = time.astype(jnp.float32).reshape(B)
    pad = Rp * groups - B
    if pad:
        t_flat = jnp.pad(t_flat, (0, pad))
    t_packed = t_flat.reshape(Rp, groups)

    out_packed = pl.pallas_call(
        functools.partial(_sinusoidal_kernel, groups=groups),
        out_shape=jax.ShapeDtypeStruct((Rp, L), out_dtype),
        grid=(Rp // TB,),
        in_specs=[pl.BlockSpec((TB, groups), lambda i: (i, 0)),
                  pl.BlockSpec((w.shape[0], L), lambda i: (0, 0)),
                  pl.BlockSpec((1, L), lambda i: (0, 0))],
        out_specs=pl.BlockSpec((TB, L), lambda i: (i, 0)),
        compiler_params=pltpu.CompilerParams(
            dimension_semantics=("parallel",),
            vmem_limit_bytes=32 * 1024 * 1024),
    )(t_packed, w, phase_full)

    # Row-major reshape / slices back to [B, dim] are free plumbing.
    if groups > 1:
        return out_packed.reshape(Rp * groups, dim)[:B]
    return out_packed[:B, :dim]


def _reference(time, dim):
    half_dim = dim // 2
    emb = math.log(10000.0) / (half_dim - 1)
    emb = jnp.exp(jnp.arange(half_dim, dtype=jnp.float32) * -emb)
    emb = time.astype(jnp.float32)[:, None] * emb[None, :]
    return jnp.concatenate([jnp.sin(emb), jnp.cos(emb)], axis=-1)


if __name__ == "__main__":
    key = jax.random.PRNGKey(0)

    # cos(x) == sin(x + f32(pi/2)); for angles up to ~1000 rad the f32 add
    # rounds by up to ~3e-5, hence atol=2e-4 against the exact-cos reference.
    TOL = dict(atol=2e-4, rtol=1e-5)

    # Case 1: tiny module-default-ish shape (dim < 128 -> packed MXU path).
    B, DIM = 8, 32
    time_steps = jax.random.uniform(key, (B,), dtype=jnp.float32,
                                    minval=0.0, maxval=1000.0)
    out = jax.block_until_ready(sinusoidal_position_embeddings(time_steps, DIM))
    ref = _reference(time_steps, DIM)
    assert out.shape == (B, DIM), out.shape
    assert out.dtype == jnp.float32, out.dtype
    assert jnp.allclose(out, ref, **TOL), float(jnp.max(jnp.abs(out - ref)))

    # Case 2: dim == 128 path (groups == 1, broadcast multiply, no lane pad).
    B2, DIM2 = 64, 128
    t2 = jax.random.uniform(jax.random.PRNGKey(1), (B2,), dtype=jnp.float32,
                            minval=0.0, maxval=1000.0)
    out2 = jax.block_until_ready(sinusoidal_position_embeddings(t2, DIM2))
    ref2 = _reference(t2, DIM2)
    assert out2.shape == (B2, DIM2), out2.shape
    assert jnp.allclose(out2, ref2, **TOL), float(jnp.max(jnp.abs(out2 - ref2)))

    # Case 3: dim not a multiple of 128 (lane-padded, unmasked-store path).
    B3, DIM3 = 16, 160
    t3 = jax.random.uniform(jax.random.PRNGKey(2), (B3,), dtype=jnp.float32,
                            minval=0.0, maxval=1000.0)
    out3 = jax.block_until_ready(sinusoidal_position_embeddings(t3, DIM3))
    ref3 = _reference(t3, DIM3)
    assert out3.shape == (B3, DIM3), out3.shape
    assert jnp.allclose(out3, ref3, **TOL), float(jnp.max(jnp.abs(out3 - ref3)))

    print("KERNEL_OK")
</pallas_src>

<mosaic_0001>
module attributes {stable_mosaic.version = 11 : i64} {
  func.func @_sinusoidal_kernel(%arg0: i32, %arg1: memref<8x4xf32, #tpu.memory_space<vmem>>, %arg2: memref<4x128xf32, #tpu.memory_space<vmem>>, %arg3: memref<1x128xf32, #tpu.memory_space<vmem>>, %arg4: memref<8x128xf32, #tpu.memory_space<vmem>>) attributes {dimension_semantics = [#tpu.dimension_semantics<parallel>], iteration_bounds = array<i64: 1>, scalar_prefetch = 0 : i64, scratch_operands = 0 : i64, tpu.core_type = #tpu.core_type<tc>, window_params = [{transform_indices = @transform_0, window_bounds = array<i64: 8, 4>}, {pipeline_mode = #tpu.pipeline_mode<synchronous>, transform_indices = @transform_1, window_bounds = array<i64: 4, 128>}, {pipeline_mode = #tpu.pipeline_mode<synchronous>, transform_indices = @transform_2, window_bounds = array<i64: 1, 128>}, {transform_indices = @transform_3, window_bounds = array<i64: 8, 128>}]} {
    %c0 = arith.constant 0 : index
    %c0_0 = arith.constant 0 : index
    %0 = vector.load %arg1[%c0, %c0_0] : memref<8x4xf32, #tpu.memory_space<vmem>>, vector<8x4xf32>
    %c0_1 = arith.constant 0 : index
    %c0_2 = arith.constant 0 : index
    %1 = vector.load %arg3[%c0_1, %c0_2] : memref<1x128xf32, #tpu.memory_space<vmem>>, vector<1x128xf32>
    %c0_3 = arith.constant 0 : index
    %c0_4 = arith.constant 0 : index
    %2 = vector.load %arg2[%c0_3, %c0_4] : memref<4x128xf32, #tpu.memory_space<vmem>>, vector<4x128xf32>
    %cst = arith.constant dense<0.000000e+00> : vector<8x128xf32>
    %3 = tpu.matmul %0, %2, %cst {dimension_numbers = #tpu.dot_dimension_numbers<[1], [0], [0], [1], [0, 0, 1, 1], [], []>, precision = #tpu.contract_precision<fp32>} : vector<8x4xf32>, vector<4x128xf32>, vector<8x128xf32> -> vector<8x128xf32>
    %4 = vector.broadcast %1 : vector<1x128xf32> to vector<8x128xf32>
    %5 = arith.addf %3, %4 : vector<8x128xf32>
    %6 = math.sin %5 : vector<8x128xf32>
    %c0_5 = arith.constant 0 : index
    %c0_6 = arith.constant 0 : index
    %7 = vector.load %arg4[%c0_5, %c0_6] : memref<8x128xf32, #tpu.memory_space<vmem>>, vector<8x128xf32>
    tpu.vector_store %arg4[%c0_5, %c0_6], %6 {strides = array<i32>} : memref<8x128xf32, #tpu.memory_space<vmem>>, vector<8x128xf32>,
    return
  }
  func.func @transform_0(%arg0: i32) -> (i32, i32) {
    %c0_i32 = arith.constant 0 : i32
    %c0_i32_0 = arith.constant 0 : i32
    return %arg0, %c0_i32 : i32, i32
  }
  func.func @transform_1(%arg0: i32) -> (i32, i32) {
    %c0_i32 = arith.constant 0 : i32
    %c0_i32_0 = arith.constant 0 : i32
    %c0_i32_1 = arith.constant 0 : i32
    return %c0_i32, %c0_i32_0 : i32, i32
  }
  func.func @transform_2(%arg0: i32) -> (i32, i32) {
    %c0_i32 = arith.constant 0 : i32
    %c0_i32_0 = arith.constant 0 : i32
    %c0_i32_1 = arith.constant 0 : i32
    return %c0_i32, %c0_i32_0 : i32, i32
  }
  func.func @transform_3(%arg0: i32) -> (i32, i32) {
    %c0_i32 = arith.constant 0 : i32
    %c0_i32_0 = arith.constant 0 : i32
    return %arg0, %c0_i32 : i32, i32
  }
}

</mosaic_0001>

<bundles_post_ra>
// kernel: tpu_custom_call.1
= control target key start
LH: loop header
LB: loop body
LE: loop exit
PB: predicated region body
PF: predicated region fallthrough
CT: control target
= control target key end

     0   :  { %vm28_vm0 = vcmask 1043456   ;;  %v683_v2 = vmov 0.0   ;;  %vm684_vm1 = vmmov 0   ;;  %vm24_vm2 = vcmask 31744   ;;  %s751_s0 = inlined_call_operand.vmem [shape: f32[8,4], index: 0, kind: input, shape index: {}]   ;;  %s752_s1 = inlined_call_operand.vmem [shape: f32[4,128], index: 1, kind: input, shape index: {}]   ;;  %s753_s2 = inlined_call_operand.vmem [shape: f32[1,128], index: 2, kind: input, shape index: {}]   ;;  %s754_s3 = inlined_call_operand.hbm [shape: f32[8,128], index: 3, kind: output, shape index: {}]  }
   0x1   :  { %v17_v0 = vld [vmem:[%s752_s1] sm:$0xf]  ;;  %614 = vmatprep.subr.mxu0 %v683_v2  ;;  %616 = vmatprep.mubr.msk.f32.mxu0 %vm684_vm1, %v683_v2 }
   0x2   :  { %v15_v1 = vld [vmem:[%s751_s0] sm:$0xff]  ;;  %v30_v3 = vsel %vm28_vm0, %v17_v0, 0 }
   0x3   :  { %8 = vsyncpa [#allocation3], 0  ;;  %v63_v4 = vand.u32 4294901760, %v30_v3  ;;  %619 = vmatprep.subr.mxu1 %v683_v2  ;;  %v26_v5 = vsel %vm24_vm2, %v15_v1, 0  ;;  %621 = vmatprep.mubr.msk.f32.mxu1 %vm684_vm1, %v683_v2  ;;  %v597_v15 = vld [vmem:[%s753_s2] ss:$0 sm:$0xff] }
   0x4   :  { %v98_v6 = vand.u32 4294901760, %v26_v5  ;;  %v685_v44 = vmov 683565275   ;;  %v686_v46 = vmov 2475754826   ;;  %s691_s2 = smov [#allocation2]  }
   0x5   :  { %615 = vmatpush3.msra.mxu0 %v63_v4  ;;  %v140_v7 = vsub.f32 %v30_v3, %v63_v4  ;;  %v687_v49 = vmov 2131351028   ;;  %v688_v52 = vmov 2102212464   ;;  %v689_v55 = vmov 920167782  }
   0x6   :  { %624 = vmatprep.subr.mxu0 %v683_v2  ;;  %v99_v8 = vsub.f32 %v26_v5, %v98_v6  ;;  %v690_v58 = vmov 1326507024   ;;  %s589_s16 = sshll.u32 %s691_s2, 4  ;;  %s590_s16 = int_to_ptr.vmem [resolvable:$true] %s589_s16 }
   0x7   :  { %v141_v9 = vand.u32 4294901760, %v140_v7  ;;  %s661_s17 = scalar_lea.vmem %s590_s16, 128  ;;  %p666_p1 = scmp.lt.s32.totalorder %s590_s16, %s590_s16 }
   0x8   :  { %v100_v10 = vand.u32 4294901760, %v99_v8  ;;  %p662_p0 = scmp.ne.s32.totalorder %s590_s16, %s661_s17  ;;  %p667_p2 = scmp.lt.s32.totalorder %s661_s17, %s661_s17 }
   0x9   :  { %v142_v11 = vsub.f32 %v140_v7, %v141_v9 }
   0xa   :  { %v101_v12 = vsub.f32 %v99_v8, %v100_v10  ;;  %p668_p3 = por %p667_p2, %p666_p1 }
   0xb   :  { %v143_v13 = vand.u32 4294901760, %v142_v11 }
   0xc   :  { %v102_v14 = vand.u32 4294901760, %v101_v12  ;;  %p669_p4 = pnand %p668_p3, %p662_p0 }
   0xd   :  { %620 = vmatpush3.msra.mxu1 %v143_v13 }
   0xe   :  { %617 = vmatmul.mubr.f32.vlgmr.msra.gmra.mxu0 %v102_v14  ;;  %622 = vmatmul.mubr.f32.vlgmr.msra.gmra.mxu1 %v98_v6 }
   0xf   :  { %625 = vmatpush3.msra.mxu0 %v140_v7  ;;  %629 = vmatprep.subr.mxu1 %v683_v2 }
  0x10   :  { %630 = vmatpush3.msra.mxu1 %v63_v4  ;;  %626 = vmatprep.mubr.msk.f32.mxu0 %vm684_vm1, %v683_v2 }
  0x11   :  { %634 = vmatprep.subr.mxu0 %v683_v2  ;;  %631 = vmatprep.mubr.msk.f32.mxu1 %vm684_vm1, %v683_v2 }
  0x12   :  { %627 = vmatmul.mubr.f32.vlgmr.msra.gmra.mxu0 %v99_v8  ;;  %632 = vmatmul.mubr.f32.vlgmr.msra.gmra.mxu1 %v100_v10 }
  0x13   :  { %635 = vmatpush3.msra.mxu0 %v141_v9  ;;  %639 = vmatprep.subr.mxu1 %v683_v2 }
  0x14   :  { %640 = vmatpush3.msra.mxu1 %v63_v4  ;;  %636 = vmatprep.mubr.msk.f32.mxu0 %vm684_vm1, %v683_v2 }
  0x15   :  { %641 = vmatprep.mubr.msk.f32.mxu1 %vm684_vm1, %v683_v2 }
  0x16   :  { %637 = vmatmul.mubr.f32.vlgmr.msra.gmra.mxu0 %v98_v6  ;;  %642 = vmatmul.mubr.f32.vlgmr.msra.gmra.mxu1 %v98_v6 }
  0xce   :  { %v104_v16 = vpop.f32.mrf.mxu0  ;;  %v180_v17 = vpop.f32.mrf.mxu1 }
  0xcf   :  { %v105_v18 = vadd.f32 %v597_v15, %v104_v16 }
  0xd0   :  { %v618_v19 = vpop.f32.mrf.mxu0  ;;  %v623_v20 = vpop.f32.mrf.mxu1 }
  0xd1   :  { %v181_v21 = vadd.f32 %v180_v17, %v105_v18 }
  0xd2   :  { %v254_v22 = vpop.f32.mrf.mxu0  ;;  %v328_v23 = vpop.f32.mrf.mxu1 }
  0xd3   :  { %v255_v24 = vadd.f32 %v254_v22, %v181_v21 }
  0xd4   :  { %v628_v25 = vpop.f32.mrf.mxu0  ;;  %v633_v26 = vpop.f32.mrf.mxu1 }
  0xd5   :  { %v329_v27 = vadd.f32 %v328_v23, %v255_v24 }
  0xd6   :  { %v402_v28 = vpop.f32.mrf.mxu0  ;;  %v474_v29 = vpop.f32.mrf.mxu1 }
  0xd7   :  { %v403_v30 = vadd.f32 %v402_v28, %v329_v27 }
  0xd8   :  { %v638_v31 = vpop.f32.mrf.mxu0  ;;  %v643_v32 = vpop.f32.mrf.mxu1 }
  0xd9   :  { %v727_v33 = vadd.f32 %v474_v29, %v403_v30 }
  0xdb   :  { %v481_v34 = vand.u32 2139095040, %v727_v33  ;;  %v478_v38 = vand.u32 2147483647, %v727_v33  ;;  %vm480_vm10 = vcmp.lt.s32.totalorder %v727_v33, 0  ;;  %vm570_vm15 = vweird.f32 %v727_v33 }
  0xdd   :  { %v482_v35 = vshrl.u32 %v481_v34, 23  ;;  %v485_v41 = vand.u32 8388607, %v478_v38  ;;  %vm479_vm11 = vcmp.le.f32.partialorder %v478_v38, 0.7853982 }
  0xdf   :  { %v598_v36 = vadd.s32 4294967169, %v482_v35  ;;  %v486_v60 = vor.u32 8388608, %v485_v41 }
  0xe1   :  { %v488_v37 = vadd.s32 1, %v598_v36  ;;  %v526_v10 = vshll.u32 %v486_v60, 8 }
  0xe3   :  { %vm489_vm3 = vcmp.gt.s32.totalorder %v488_v37, 0 }
  0xe4   :  { %v490_v39 = vsel %vm489_vm3, %v488_v37, 0 }
  0xe5   :  { %v492_v40 = vand.u32 31, %v490_v39  ;;  %v491_v43 = vshrl.u32 %v490_v39, 5 }
  0xe7   :  { %v493_v42 = vsub.s32 32, %v492_v40  ;;  %v495_v45 = vshll.u32 %v685_v44, %v492_v40  ;;  %v498_v47 = vshll.u32 %v686_v46, %v492_v40  ;;  %v501_v51 = vshll.u32 %v687_v49, %v492_v40 }
  0xe8   :  { %v504_v54 = vshll.u32 %v688_v52, %v492_v40  ;;  %v507_v57 = vshll.u32 %v689_v55, %v492_v40  ;;  %vm510_vm4 = vcmp.lt.s32.totalorder %v491_v43, 1  ;;  %vm513_vm5 = vcmp.lt.s32.totalorder %v491_v43, 4 }
  0xe9   :  { %v496_v48 = vshrl.u32 %v686_v46, %v493_v42  ;;  %v499_v50 = vshrl.u32 %v687_v49, %v493_v42  ;;  %v502_v53 = vshrl.u32 %v688_v52, %v493_v42  ;;  %v505_v56 = vshrl.u32 %v689_v55, %v493_v42 }
  0xea   :  { %v508_v59 = vshrl.u32 %v690_v58, %v493_v42  ;;  %v494_v5 = vshrl.u32 %v685_v44, %v493_v42  ;;  %vm512_vm6 = vcmp.lt.s32.totalorder %v491_v43, 3  ;;  %vm511_vm7 = vcmp.lt.s32.totalorder %v491_v43, 2 }
  0xeb   :  { %v497_v61 = vor.u32 %v496_v48, %v495_v45  ;;  %v500_v62 = vor.u32 %v499_v50, %v498_v47  ;;  %v503_v63 = vor.u32 %v502_v53, %v501_v51  ;;  %v506_v0 = vor.u32 %v505_v56, %v504_v54 }
  0xec   :  { %v509_v1 = vor.u32 %v508_v59, %v507_v57 }
  0xed   :  { %v515_v2 = vsel %vm513_vm5, %v503_v63, 2102212464  ;;  %v518_v3 = vsel %vm510_vm4, %v497_v61, %v500_v62  ;;  %v522_v4 = vsel %vm510_vm4, %v500_v62, %v503_v63  ;;  %v519_v6 = vsel %vm513_vm5, %v506_v0, 920167782 }
  0xee   :  { %v523_v7 = vsel %vm513_vm5, %v509_v1, 1326507024  ;;  %v520_v8 = vsel %vm512_vm6, %v503_v63, %v519_v6  ;;  %v514_v11 = vsel %vm510_vm4, %v494_v5, %v497_v61  ;;  %v516_v12 = vsel %vm512_vm6, %v500_v62, %v515_v2 }
  0xef   :  { %v524_v9 = vsel %vm512_vm6, %v506_v0, %v523_v7  ;;  %v521_v13 = vsel %vm511_vm7, %v518_v3, %v520_v8  ;;  %v517_v19 = vsel %vm511_vm7, %v514_v11, %v516_v12 }
  0xf0   :  { %v525_v14 = vsel %vm511_vm7, %v522_v4, %v524_v9  ;;  %v736_v17 = vmul.u32.u64.low %v526_v10, %v521_v13  ;;  %v737_v18 = vmul.u32.u64.high %v526_v10, %v521_v13, %v736_v17  ;;  %v533_v21 = vmul.u32 %v526_v10, %v517_v19 }
  0xf1   :  { %v733_v15 = vmul.u32.u64.low %v526_v10, %v525_v14  ;;  %v734_v16 = vmul.u32.u64.high %v526_v10, %v525_v14, %v733_v15 }
  0xf2   :  { %v536_v20 = vadd.s32 1, %v737_v18 }
  0xf3   :  { %vm535_vm8 = vc.u32 %v734_v16, %v736_v17  ;;  %v534_v34 = vadd.s32 %v736_v17, %v734_v16 }
  0xf4   :  { %v537_v22 = vsel %vm535_vm8, %v536_v20, %v737_v18 }
  0xf5   :  { %v538_v23 = vadd.s32 %v537_v22, %v533_v21 }
  0xf7   :  { %v539_v24 = vadd.s32 536870912, %v538_v23 }
  0xf9   :  { %v540_v25 = vshrl.u32 %v539_v24, 30 }
  0xfb   :  { %v541_v26 = vshll.u32 %v540_v25, 30  ;;  %v564_v48 = vsub.s32 4, %v540_v25 }
  0xfd   :  { %v542_v27 = vsub.s32 %v538_v23, %v541_v26  ;;  %v565_v51 = vsel %vm480_vm10, %v564_v48, %v540_v25 }
  0xfe   :  { %v567_v52 = vsel %vm479_vm11, 0, %v565_v51 }
  0xff   :  { %v544_v28 = vsub.s32 0, %v542_v27  ;;  %v571_v53 = vadd.s32 3, %v567_v52 }
 0x101   :  { %v599_v29 = vmin.u32 %v544_v28, %v542_v27  ;;  %v572_v54 = vand.u32 3, %v571_v53 }
 0x103   :  { %v546_v30 = vclz %v599_v29  ;;  %vm577_vm12 = vcmp.eq.s32.totalorder %v572_v54, 2  ;;  %vm574_vm13 = vcmp.eq.s32.totalorder %v572_v54, 0  ;;  %vm573_vm14 = vcmp.lt.s32.totalorder %v572_v54, 2 }
 0x105   :  { %v600_v31 = vadd.s32 4294967294, %v546_v30 }
 0x107   :  { %vm601_vm9 = vcmp.lt.s32.totalorder %v600_v31, 0 }
 0x108   :  { %v549_v32 = vsel %vm601_vm9, 0, %v600_v31 }
 0x109   :  { %v550_v35 = vsub.s32 32, %v549_v32  ;;  %v554_v36 = vsub.s32 4294967266, %v549_v32  ;;  %v551_v37 = vshll.u32 %v542_v27, %v549_v32 }
 0x10b   :  { %v552_v39 = vshrl.u32 %v534_v34, %v550_v35  ;;  %v555_v40 = vadd.s32 127, %v554_v36 }
 0x10d   :  { %v553_v41 = vor.u32 %v552_v39, %v551_v37  ;;  %v556_v42 = vshll.u32 %v555_v40, 23 }
 0x10f   :  { %v557_v43 = vor.u32 4788187, %v556_v42  ;;  %v560_v45 = vcvt.s32.f32 %v553_v41 }
 0x111   :  { %v558_v44 = vand.u32 2147483647, %v557_v43 }
 0x113   :  { %v561_v46 = vmul.f32 %v560_v45, %v558_v44 }
 0x115   :  { %v562_v47 = vxor.u32 2147483648, %v561_v46 }
 0x117   :  { %v563_v49 = vsel %vm480_vm10, %v562_v47, %v561_v46 }
 0x118   :  { %v566_v50 = vsel %vm479_vm11, %v727_v33, %v563_v49 }
 0x119   :  { %657 = vcosq.f32 %v566_v50 }
 0x11a   :  { %659 = vsinq.f32 %v566_v50 }
 0x126   :  { %v658_v55 = vpop.eup %657 }
 0x127   :  { %v660_v56 = vpop.eup %659  ;;  %v578_v57 = vxor.u32 2147483648, %v658_v55 }
 0x128   :  { %v575_v58 = vxor.u32 2147483648, %v660_v56 }
 0x129   :  { %v579_v59 = vsel %vm577_vm12, %v578_v57, %v660_v56 }
 0x12a   :  { %v576_v60 = vsel %vm574_vm13, %v658_v55, %v575_v58 }
 0x12b   :  { %v580_v38 = vsel %vm573_vm14, %v576_v60, %v579_v59 }
 0x12c   :  { %v581_v61 = vsel %vm570_vm15, nan, %v580_v38 }
 0x12d   :  { %582 = vst [vmem:[#allocation2] sm:$0xff] %v581_v61 }
 0x12e   :  { %672 = shalt.err (!%p669_p4)
}
 0x12f   :  { %592 = dma.vmem_to_hbm [thread:$0]  %s590_s16, 128, %s754_s3, [#allocation3]  }
 0x130   :  { %681 = dma.done.wait [#allocation3], 128  }
 0x131   :  { %682 = vsyncadd [#allocation3], 4294967168 }
 0x132   :  { %596 = vsyncpa [#allocation3], 1 }

</bundles_post_ra>
